<compile_context>
chip_gen: v6e
topology: v6e:2x2x1
jax: 0.10.0
libtpu: 0.0.40
codegen_flags: <defaults>
</compile_context>

<pallas_src>
import jax
import jax.numpy as jnp
from jax import lax
from jax.experimental import pallas as pl
from jax.experimental.pallas import tpu as pltpu

# ---------------- model configuration ----------------
SEQ = 10                  # x.view(N, 10, -1)
EMBED = 20                # embed_size
HEADS = 2
HEAD_DIM = EMBED // HEADS # 10
INPUT_DIM = SEQ * EMBED   # 200 (see TODO above)
HIDDEN = 256              # fc1 output
SCALE = 1.0 / (float(EMBED) ** 0.5)

# ---------------- lane/sublane padded sizes ----------------
SP = 16                   # SEQ padded to sublane multiple (8)
DP = 128                  # HEAD_DIM padded to lane width
EP = 128                  # EMBED padded to lane width
KP = 256                  # SEQ*EMBED (200) padded to lane multiple
OP = 128                  # EMBED (fc2 out) padded to lane width


def _rup(x, m):
    return (x + m - 1) // m * m


# ---------------- Pallas kernels ----------------
def _attention_kernel(x_ref, wq_ref, wk_ref, wv_ref, wo_ref, bo_ref, o_ref):
    """Fused multi-head self-attention + output projection for one batch row.

    x_ref : (1, HEADS, SP, DP) bf16   per-head padded input
    wq/wk/wv_ref : (DP, DP) bf16      shared per-head projections (no bias)
    wo_ref : (HEADS, DP, EP) bf16     fc_out weight, split per head
    bo_ref : (1, EP) f32              fc_out bias
    o_ref  : (1, SP, EP) f32          attention block output
    """
    acc = jnp.broadcast_to(bo_ref[...], (SP, EP)).astype(jnp.float32)
    # mask out padded key positions (>= SEQ); hoisted out of the head loop
    kmask = lax.broadcasted_iota(jnp.int32, (SP, SP), 1) < SEQ

    for h in range(HEADS):                       # static unroll, HEADS == 2
        xh = x_ref[0, h]                         # (SP, DP) bf16
        q = jnp.dot(xh, wq_ref[...], preferred_element_type=jnp.float32)
        k = jnp.dot(xh, wk_ref[...], preferred_element_type=jnp.float32)
        v = jnp.dot(xh, wv_ref[...], preferred_element_type=jnp.float32)

        # scores = q @ k^T / sqrt(embed_size)   (contraction over head_dim)
        s = lax.dot_general(q.astype(jnp.bfloat16), k.astype(jnp.bfloat16),
                            (((1,), (1,)), ((), ())),
                            preferred_element_type=jnp.float32)
        s = s * SCALE
        s = jnp.where(kmask, s, -1e30)

        # softmax over keys (f32)
        m = jnp.max(s, axis=-1, keepdims=True)
        e = jnp.exp(s - m)
        p = e / jnp.sum(e, axis=-1, keepdims=True)

        att = jnp.dot(p.astype(jnp.bfloat16), v.astype(jnp.bfloat16),
                      preferred_element_type=jnp.float32)      # (SP, DP)
        # fc_out contribution of this head
        acc = acc + jnp.dot(att.astype(jnp.bfloat16), wo_ref[h],
                            preferred_element_type=jnp.float32)  # (SP, EP)

    o_ref[0] = acc


def _mlp_kernel(x_ref, w1_ref, b1_ref, w2_ref, b2_ref, o_ref):
    """out = relu(x @ W1 + b1) @ W2 + b2, all in one kernel."""
    h = jnp.dot(x_ref[...], w1_ref[...], preferred_element_type=jnp.float32)
    h = jnp.maximum(h + b1_ref[...], 0.0)
    o = jnp.dot(h.astype(jnp.bfloat16), w2_ref[...],
                preferred_element_type=jnp.float32)
    o_ref[...] = o + b2_ref[...]


# ---------------- pallas_call wrappers ----------------
def _attention(xh, wq, wk, wv, wo, bo):
    n = xh.shape[0]
    return pl.pallas_call(
        _attention_kernel,
        out_shape=jax.ShapeDtypeStruct((n, SP, EP), jnp.float32),
        grid_spec=pltpu.PrefetchScalarGridSpec(
            num_scalar_prefetch=0,
            grid=(n,),
            in_specs=[
                pl.BlockSpec((1, HEADS, SP, DP), lambda i: (i, 0, 0, 0)),
                pl.BlockSpec((DP, DP), lambda i: (0, 0)),
                pl.BlockSpec((DP, DP), lambda i: (0, 0)),
                pl.BlockSpec((DP, DP), lambda i: (0, 0)),
                pl.BlockSpec((HEADS, DP, EP), lambda i: (0, 0, 0)),
                pl.BlockSpec((1, EP), lambda i: (0, 0)),
            ],
            out_specs=pl.BlockSpec((1, SP, EP), lambda i: (i, 0, 0)),
        ),
        compiler_params=pltpu.CompilerParams(
            dimension_semantics=("parallel",)),
    )(xh, wq, wk, wv, wo, bo)


def _mlp(x, w1, b1, w2, b2):
    rows = x.shape[0]
    return pl.pallas_call(
        _mlp_kernel,
        out_shape=jax.ShapeDtypeStruct((rows, OP), jnp.float32),
    )(x, w1, b1, w2, b2)


# ---------------- parameter init (pre-padded, pre-cast) ----------------
def _uniform(key, shape, fan_in):
    bound = 1.0 / (float(fan_in) ** 0.5)
    return jax.random.uniform(key, shape, jnp.float32, -bound, bound)


def _pad2(a, r, c):
    return jnp.pad(a, ((0, r - a.shape[0]), (0, c - a.shape[1])))


def init_params(key):
    ks = jax.random.split(key, 9)
    D, E = HEAD_DIM, EMBED
    wq = _uniform(ks[0], (D, D), D)          # values/keys/queries: Linear(D, D, bias=False)
    wk = _uniform(ks[1], (D, D), D)
    wv = _uniform(ks[2], (D, D), D)
    wo = _uniform(ks[3], (E, E), E)          # fc_out: Linear(heads*head_dim, embed)
    bo = _uniform(ks[4], (E,), E)
    w1 = _uniform(ks[5], (INPUT_DIM, HIDDEN), INPUT_DIM)   # fc1
    b1 = _uniform(ks[6], (HIDDEN,), INPUT_DIM)
    w2 = _uniform(ks[7], (HIDDEN, EMBED), HIDDEN)          # fc2
    b2 = _uniform(ks[8], (EMBED,), HIDDEN)

    p = {}
    p['wq'] = _pad2(wq, DP, DP).astype(jnp.bfloat16)
    p['wk'] = _pad2(wk, DP, DP).astype(jnp.bfloat16)
    p['wv'] = _pad2(wv, DP, DP).astype(jnp.bfloat16)
    # fc_out: concat-of-heads input -> split the weight per head: (HEADS, D, E)
    wo3 = wo.reshape(HEADS, D, E)
    p['wo'] = jnp.pad(wo3, ((0, 0), (0, DP - D), (0, EP - E))).astype(jnp.bfloat16)
    p['bo'] = jnp.pad(bo, (0, EP - E)).reshape(1, EP).astype(jnp.float32)
    p['w1'] = _pad2(w1, KP, HIDDEN).astype(jnp.bfloat16)
    p['b1'] = b1.reshape(1, HIDDEN).astype(jnp.float32)
    p['w2'] = _pad2(w2, HIDDEN, OP).astype(jnp.bfloat16)
    p['b2'] = jnp.pad(b2, (0, OP - EMBED)).reshape(1, OP).astype(jnp.float32)
    return p


# ---------------- forward ----------------
@jax.jit
def forward(params, x):
    n = x.shape[0]
    # x.view(N, 10, -1) then split heads -> (N, H, S, D)
    x3 = x.reshape(n, SEQ, EMBED)
    x4 = x3.reshape(n, SEQ, HEADS, HEAD_DIM)
    xh = jnp.transpose(x4, (0, 2, 1, 3))
    xh = jnp.pad(xh, ((0, 0), (0, 0), (0, SP - SEQ),
                      (0, DP - HEAD_DIM))).astype(jnp.bfloat16)

    # fused self-attention + fc_out
    att = _attention(xh, params['wq'], params['wk'], params['wv'],
                     params['wo'], params['bo'])          # (N, SP, EP) f32
    att = att[:, :SEQ, :EMBED]                            # drop padding
    y = att.reshape(n, SEQ * EMBED)                       # x.view(N, -1)

    # fused fc1 + ReLU + fc2
    rows = _rup(max(n, 8), 8)
    yp = jnp.pad(y, ((0, rows - n), (0, KP - SEQ * EMBED))).astype(jnp.bfloat16)
    out = _mlp(yp, params['w1'], params['b1'], params['w2'], params['b2'])
    return out[:n, :EMBED]


if __name__ == "__main__":
    key = jax.random.PRNGKey(0)
    kp, kx = jax.random.split(key)
    params = init_params(kp)
    x = jax.random.normal(kx, (2, INPUT_DIM), jnp.float32)   # (batch=2, 200)

    out = forward(params, x)
    jax.block_until_ready(out)

    assert out.shape == (2, EMBED)
    assert bool(jnp.all(jnp.isfinite(out)))
    print("KERNEL_OK")
</pallas_src>

<mosaic_0001>
module attributes {stable_mosaic.version = 11 : i64} {
  func.func @_attention_kernel(%arg0: i32, %arg1: memref<1x2x16x128xbf16, #tpu.memory_space<vmem>>, %arg2: memref<128x128xbf16, #tpu.memory_space<vmem>>, %arg3: memref<128x128xbf16, #tpu.memory_space<vmem>>, %arg4: memref<128x128xbf16, #tpu.memory_space<vmem>>, %arg5: memref<2x128x128xbf16, #tpu.memory_space<vmem>>, %arg6: memref<1x128xf32, #tpu.memory_space<vmem>>, %arg7: memref<1x16x128xf32, #tpu.memory_space<vmem>>) attributes {dimension_semantics = [#tpu.dimension_semantics<parallel>], iteration_bounds = array<i64: 2>, scalar_prefetch = 0 : i64, scratch_operands = 0 : i64, tpu.core_type = #tpu.core_type<tc>, window_params = [{transform_indices = @transform_0, window_bounds = array<i64: 1, 2, 16, 128>}, {pipeline_mode = #tpu.pipeline_mode<synchronous>, transform_indices = @transform_1, window_bounds = array<i64: 128, 128>}, {pipeline_mode = #tpu.pipeline_mode<synchronous>, transform_indices = @transform_2, window_bounds = array<i64: 128, 128>}, {pipeline_mode = #tpu.pipeline_mode<synchronous>, transform_indices = @transform_3, window_bounds = array<i64: 128, 128>}, {pipeline_mode = #tpu.pipeline_mode<synchronous>, transform_indices = @transform_4, window_bounds = array<i64: 2, 128, 128>}, {pipeline_mode = #tpu.pipeline_mode<synchronous>, transform_indices = @transform_5, window_bounds = array<i64: 1, 128>}, {transform_indices = @transform_6, window_bounds = array<i64: 1, 16, 128>}]} {
    %c0 = arith.constant 0 : index
    %c0_0 = arith.constant 0 : index
    %0 = vector.load %arg6[%c0, %c0_0] : memref<1x128xf32, #tpu.memory_space<vmem>>, vector<1x128xf32>
    %1 = vector.shape_cast %0 : vector<1x128xf32> to vector<1x128xf32>
    %2 = vector.broadcast %1 : vector<1x128xf32> to vector<16x128xf32>
    %3 = tpu.iota {dimensions = array<i32: 1>} : vector<16x16xi32>
    %c10_i32 = arith.constant 10 : i32
    %4 = vector.broadcast %c10_i32 : i32 to vector<16x16xi32>
    %5 = arith.cmpi slt, %3, %4 : vector<16x16xi32>
    %c0_1 = arith.constant 0 : index
    %c0_2 = arith.constant 0 : index
    %c0_3 = arith.constant 0 : index
    %c0_4 = arith.constant 0 : index
    %6 = vector.load %arg1[%c0_1, %c0_2, %c0_3, %c0_4] : memref<1x2x16x128xbf16, #tpu.memory_space<vmem>>, vector<1x1x16x128xbf16>
    %7 = vector.shape_cast %6 : vector<1x1x16x128xbf16> to vector<16x128xbf16>
    %c0_5 = arith.constant 0 : index
    %c0_6 = arith.constant 0 : index
    %8 = vector.load %arg2[%c0_5, %c0_6] : memref<128x128xbf16, #tpu.memory_space<vmem>>, vector<128x128xbf16>
    %cst = arith.constant dense<0.000000e+00> : vector<16x128xf32>
    %9 = tpu.matmul %7, %8, %cst {dimension_numbers = #tpu.dot_dimension_numbers<[1], [0], [0], [1], [0, 0, 1, 1], [], []>} : vector<16x128xbf16>, vector<128x128xbf16>, vector<16x128xf32> -> vector<16x128xf32>
    %c0_7 = arith.constant 0 : index
    %c0_8 = arith.constant 0 : index
    %10 = vector.load %arg3[%c0_7, %c0_8] : memref<128x128xbf16, #tpu.memory_space<vmem>>, vector<128x128xbf16>
    %cst_9 = arith.constant dense<0.000000e+00> : vector<16x128xf32>
    %11 = tpu.matmul %7, %10, %cst_9 {dimension_numbers = #tpu.dot_dimension_numbers<[1], [0], [0], [1], [0, 0, 1, 1], [], []>} : vector<16x128xbf16>, vector<128x128xbf16>, vector<16x128xf32> -> vector<16x128xf32>
    %c0_10 = arith.constant 0 : index
    %c0_11 = arith.constant 0 : index
    %12 = vector.load %arg4[%c0_10, %c0_11] : memref<128x128xbf16, #tpu.memory_space<vmem>>, vector<128x128xbf16>
    %cst_12 = arith.constant dense<0.000000e+00> : vector<16x128xf32>
    %13 = tpu.matmul %7, %12, %cst_12 {dimension_numbers = #tpu.dot_dimension_numbers<[1], [0], [0], [1], [0, 0, 1, 1], [], []>} : vector<16x128xbf16>, vector<128x128xbf16>, vector<16x128xf32> -> vector<16x128xf32>
    %14 = arith.truncf %9 : vector<16x128xf32> to vector<16x128xbf16>
    %15 = arith.truncf %11 : vector<16x128xf32> to vector<16x128xbf16>
    %cst_13 = arith.constant dense<0.000000e+00> : vector<16x16xf32>
    %16 = tpu.matmul %14, %15, %cst_13 {dimension_numbers = #tpu.dot_dimension_numbers<[1], [1], [0], [0], [0, 0, 1, 0], [], []>} : vector<16x128xbf16>, vector<16x128xbf16>, vector<16x16xf32> -> vector<16x16xf32>
    %cst_14 = arith.constant 0.223606795 : f32
    %17 = vector.broadcast %cst_14 : f32 to vector<16x16xf32>
    %18 = arith.mulf %16, %17 : vector<16x16xf32>
    %cst_15 = arith.constant -1.000000e+30 : f32
    %19 = vector.broadcast %cst_15 : f32 to vector<16x16xf32>
    %20 = arith.select %5, %18, %19 : vector<16x16xi1>, vector<16x16xf32>
    %cst_16 = arith.constant dense<0xFF800000> : vector<16xf32>
    %21 = vector.multi_reduction <maximumf>, %20, %cst_16 [1] : vector<16x16xf32> to vector<16xf32>
    %22 = vector.shape_cast %21 : vector<16xf32> to vector<16x1xf32>
    %23 = vector.broadcast %22 : vector<16x1xf32> to vector<16x16xf32>
    %24 = arith.subf %20, %23 : vector<16x16xf32>
    %25 = math.exp %24 : vector<16x16xf32>
    %cst_17 = arith.constant dense<0.000000e+00> : vector<16xf32>
    %26 = vector.multi_reduction <add>, %25, %cst_17 [1] : vector<16x16xf32> to vector<16xf32>
    %27 = vector.shape_cast %26 : vector<16xf32> to vector<16x1xf32>
    %28 = vector.broadcast %27 : vector<16x1xf32> to vector<16x16xf32>
    %29 = arith.divf %25, %28 : vector<16x16xf32>
    %30 = arith.truncf %29 : vector<16x16xf32> to vector<16x16xbf16>
    %31 = arith.truncf %13 : vector<16x128xf32> to vector<16x128xbf16>
    %cst_18 = arith.constant dense<0.000000e+00> : vector<16x128xf32>
    %32 = tpu.matmul %30, %31, %cst_18 {dimension_numbers = #tpu.dot_dimension_numbers<[1], [0], [0], [1], [0, 0, 1, 1], [], []>} : vector<16x16xbf16>, vector<16x128xbf16>, vector<16x128xf32> -> vector<16x128xf32>
    %33 = arith.truncf %32 : vector<16x128xf32> to vector<16x128xbf16>
    %c0_19 = arith.constant 0 : index
    %c0_20 = arith.constant 0 : index
    %c0_21 = arith.constant 0 : index
    %34 = vector.load %arg5[%c0_19, %c0_20, %c0_21] : memref<2x128x128xbf16, #tpu.memory_space<vmem>>, vector<1x128x128xbf16>
    %35 = vector.shape_cast %34 : vector<1x128x128xbf16> to vector<128x128xbf16>
    %cst_22 = arith.constant dense<0.000000e+00> : vector<16x128xf32>
    %36 = tpu.matmul %33, %35, %cst_22 {dimension_numbers = #tpu.dot_dimension_numbers<[1], [0], [0], [1], [0, 0, 1, 1], [], []>} : vector<16x128xbf16>, vector<128x128xbf16>, vector<16x128xf32> -> vector<16x128xf32>
    %37 = arith.addf %2, %36 : vector<16x128xf32>
    %c0_23 = arith.constant 0 : index
    %c1 = arith.constant 1 : index
    %c0_24 = arith.constant 0 : index
    %c0_25 = arith.constant 0 : index
    %38 = vector.load %arg1[%c0_23, %c1, %c0_24, %c0_25] : memref<1x2x16x128xbf16, #tpu.memory_space<vmem>>, vector<1x1x16x128xbf16>
    %39 = vector.shape_cast %38 : vector<1x1x16x128xbf16> to vector<16x128xbf16>
    %c0_26 = arith.constant 0 : index
    %c0_27 = arith.constant 0 : index
    %40 = vector.load %arg2[%c0_26, %c0_27] : memref<128x128xbf16, #tpu.memory_space<vmem>>, vector<128x128xbf16>
    %cst_28 = arith.constant dense<0.000000e+00> : vector<16x128xf32>
    %41 = tpu.matmul %39, %40, %cst_28 {dimension_numbers = #tpu.dot_dimension_numbers<[1], [0], [0], [1], [0, 0, 1, 1], [], []>} : vector<16x128xbf16>, vector<128x128xbf16>, vector<16x128xf32> -> vector<16x128xf32>
    %c0_29 = arith.constant 0 : index
    %c0_30 = arith.constant 0 : index
    %42 = vector.load %arg3[%c0_29, %c0_30] : memref<128x128xbf16, #tpu.memory_space<vmem>>, vector<128x128xbf16>
    %cst_31 = arith.constant dense<0.000000e+00> : vector<16x128xf32>
    %43 = tpu.matmul %39, %42, %cst_31 {dimension_numbers = #tpu.dot_dimension_numbers<[1], [0], [0], [1], [0, 0, 1, 1], [], []>} : vector<16x128xbf16>, vector<128x128xbf16>, vector<16x128xf32> -> vector<16x128xf32>
    %c0_32 = arith.constant 0 : index
    %c0_33 = arith.constant 0 : index
    %44 = vector.load %arg4[%c0_32, %c0_33] : memref<128x128xbf16, #tpu.memory_space<vmem>>, vector<128x128xbf16>
    %cst_34 = arith.constant dense<0.000000e+00> : vector<16x128xf32>
    %45 = tpu.matmul %39, %44, %cst_34 {dimension_numbers = #tpu.dot_dimension_numbers<[1], [0], [0], [1], [0, 0, 1, 1], [], []>} : vector<16x128xbf16>, vector<128x128xbf16>, vector<16x128xf32> -> vector<16x128xf32>
    %46 = arith.truncf %41 : vector<16x128xf32> to vector<16x128xbf16>
    %47 = arith.truncf %43 : vector<16x128xf32> to vector<16x128xbf16>
    %cst_35 = arith.constant dense<0.000000e+00> : vector<16x16xf32>
    %48 = tpu.matmul %46, %47, %cst_35 {dimension_numbers = #tpu.dot_dimension_numbers<[1], [1], [0], [0], [0, 0, 1, 0], [], []>} : vector<16x128xbf16>, vector<16x128xbf16>, vector<16x16xf32> -> vector<16x16xf32>
    %cst_36 = arith.constant 0.223606795 : f32
    %49 = vector.broadcast %cst_36 : f32 to vector<16x16xf32>
    %50 = arith.mulf %48, %49 : vector<16x16xf32>
    %cst_37 = arith.constant -1.000000e+30 : f32
    %51 = vector.broadcast %cst_37 : f32 to vector<16x16xf32>
    %52 = arith.select %5, %50, %51 : vector<16x16xi1>, vector<16x16xf32>
    %cst_38 = arith.constant dense<0xFF800000> : vector<16xf32>
    %53 = vector.multi_reduction <maximumf>, %52, %cst_38 [1] : vector<16x16xf32> to vector<16xf32>
    %54 = vector.shape_cast %53 : vector<16xf32> to vector<16x1xf32>
    %55 = vector.broadcast %54 : vector<16x1xf32> to vector<16x16xf32>
    %56 = arith.subf %52, %55 : vector<16x16xf32>
    %57 = math.exp %56 : vector<16x16xf32>
    %cst_39 = arith.constant dense<0.000000e+00> : vector<16xf32>
    %58 = vector.multi_reduction <add>, %57, %cst_39 [1] : vector<16x16xf32> to vector<16xf32>
    %59 = vector.shape_cast %58 : vector<16xf32> to vector<16x1xf32>
    %60 = vector.broadcast %59 : vector<16x1xf32> to vector<16x16xf32>
    %61 = arith.divf %57, %60 : vector<16x16xf32>
    %62 = arith.truncf %61 : vector<16x16xf32> to vector<16x16xbf16>
    %63 = arith.truncf %45 : vector<16x128xf32> to vector<16x128xbf16>
    %cst_40 = arith.constant dense<0.000000e+00> : vector<16x128xf32>
    %64 = tpu.matmul %62, %63, %cst_40 {dimension_numbers = #tpu.dot_dimension_numbers<[1], [0], [0], [1], [0, 0, 1, 1], [], []>} : vector<16x16xbf16>, vector<16x128xbf16>, vector<16x128xf32> -> vector<16x128xf32>
    %65 = arith.truncf %64 : vector<16x128xf32> to vector<16x128xbf16>
    %c1_41 = arith.constant 1 : index
    %c0_42 = arith.constant 0 : index
    %c0_43 = arith.constant 0 : index
    %66 = vector.load %arg5[%c1_41, %c0_42, %c0_43] : memref<2x128x128xbf16, #tpu.memory_space<vmem>>, vector<1x128x128xbf16>
    %67 = vector.shape_cast %66 : vector<1x128x128xbf16> to vector<128x128xbf16>
    %cst_44 = arith.constant dense<0.000000e+00> : vector<16x128xf32>
    %68 = tpu.matmul %65, %67, %cst_44 {dimension_numbers = #tpu.dot_dimension_numbers<[1], [0], [0], [1], [0, 0, 1, 1], [], []>} : vector<16x128xbf16>, vector<128x128xbf16>, vector<16x128xf32> -> vector<16x128xf32>
    %69 = arith.addf %37, %68 : vector<16x128xf32>
    %c0_45 = arith.constant 0 : index
    %c0_46 = arith.constant 0 : index
    %c0_47 = arith.constant 0 : index
    %70 = vector.load %arg7[%c0_45, %c0_46, %c0_47] : memref<1x16x128xf32, #tpu.memory_space<vmem>>, vector<1x16x128xf32>
    %71 = vector.shape_cast %70 : vector<1x16x128xf32> to vector<16x128xf32>
    %72 = vector.shape_cast %69 : vector<16x128xf32> to vector<1x16x128xf32>
    tpu.vector_store %arg7[%c0_45, %c0_46, %c0_47], %72 {strides = array<i32>} : memref<1x16x128xf32, #tpu.memory_space<vmem>>, vector<1x16x128xf32>,
    return
  }
  func.func @transform_0(%arg0: i32) -> (i32, i32, i32, i32) {
    %c0_i32 = arith.constant 0 : i32
    %c0_i32_0 = arith.constant 0 : i32
    %c0_i32_1 = arith.constant 0 : i32
    %c0_i32_2 = arith.constant 0 : i32
    return %arg0, %c0_i32, %c0_i32_0, %c0_i32_1 : i32, i32, i32, i32
  }
  func.func @transform_1(%arg0: i32) -> (i32, i32) {
    %c0_i32 = arith.constant 0 : i32
    %c0_i32_0 = arith.constant 0 : i32
    %c0_i32_1 = arith.constant 0 : i32
    return %c0_i32, %c0_i32_0 : i32, i32
  }
  func.func @transform_2(%arg0: i32) -> (i32, i32) {
    %c0_i32 = arith.constant 0 : i32
    %c0_i32_0 = arith.constant 0 : i32
    %c0_i32_1 = arith.constant 0 : i32
    return %c0_i32, %c0_i32_0 : i32, i32
  }
  func.func @transform_3(%arg0: i32) -> (i32, i32) {
    %c0_i32 = arith.constant 0 : i32
    %c0_i32_0 = arith.constant 0 : i32
    %c0_i32_1 = arith.constant 0 : i32
    return %c0_i32, %c0_i32_0 : i32, i32
  }
  func.func @transform_4(%arg0: i32) -> (i32, i32, i32) {
    %c0_i32 = arith.constant 0 : i32
    %c0_i32_0 = arith.constant 0 : i32
    %c0_i32_1 = arith.constant 0 : i32
    %c0_i32_2 = arith.constant 0 : i32
    return %c0_i32, %c0_i32_0, %c0_i32_1 : i32, i32, i32
  }
  func.func @transform_5(%arg0: i32) -> (i32, i32) {
    %c0_i32 = arith.constant 0 : i32
    %c0_i32_0 = arith.constant 0 : i32
    %c0_i32_1 = arith.constant 0 : i32
    return %c0_i32, %c0_i32_0 : i32, i32
  }
  func.func @transform_6(%arg0: i32) -> (i32, i32, i32) {
    %c0_i32 = arith.constant 0 : i32
    %c0_i32_0 = arith.constant 0 : i32
    %c0_i32_1 = arith.constant 0 : i32
    return %arg0, %c0_i32, %c0_i32_0 : i32, i32, i32
  }
}

module attributes {stable_mosaic.version = 11 : i64} {
  func.func @_mlp_kernel(%arg0: memref<8x256xbf16, #tpu.memory_space<vmem>>, %arg1: memref<256x256xbf16, #tpu.memory_space<vmem>>, %arg2: memref<1x256xf32, #tpu.memory_space<vmem>>, %arg3: memref<256x128xbf16, #tpu.memory_space<vmem>>, %arg4: memref<1x128xf32, #tpu.memory_space<vmem>>, %arg5: memref<8x128xf32, #tpu.memory_space<vmem>>) attributes {dimension_semantics = [], scalar_prefetch = 0 : i64, scratch_operands = 0 : i64, tpu.core_type = #tpu.core_type<tc>} {
    %c0 = arith.constant 0 : index
    %c0_0 = arith.constant 0 : index
    %0 = vector.load %arg0[%c0, %c0_0] : memref<8x256xbf16, #tpu.memory_space<vmem>>, vector<8x256xbf16>
    %c0_1 = arith.constant 0 : index
    %c0_2 = arith.constant 0 : index
    %1 = vector.load %arg1[%c0_1, %c0_2] : memref<256x256xbf16, #tpu.memory_space<vmem>>, vector<256x256xbf16>
    %cst = arith.constant dense<0.000000e+00> : vector<8x256xf32>
    %2 = tpu.matmul %0, %1, %cst {dimension_numbers = #tpu.dot_dimension_numbers<[1], [0], [0], [1], [0, 0, 1, 1], [], []>} : vector<8x256xbf16>, vector<256x256xbf16>, vector<8x256xf32> -> vector<8x256xf32>
    %c0_3 = arith.constant 0 : index
    %c0_4 = arith.constant 0 : index
    %3 = vector.load %arg2[%c0_3, %c0_4] : memref<1x256xf32, #tpu.memory_space<vmem>>, vector<1x256xf32>
    %4 = vector.broadcast %3 : vector<1x256xf32> to vector<8x256xf32>
    %5 = arith.addf %2, %4 : vector<8x256xf32>
    %cst_5 = arith.constant 0.000000e+00 : f32
    %6 = vector.broadcast %cst_5 : f32 to vector<8x256xf32>
    %7 = arith.maximumf %5, %6 : vector<8x256xf32>
    %8 = arith.truncf %7 : vector<8x256xf32> to vector<8x256xbf16>
    %c0_6 = arith.constant 0 : index
    %c0_7 = arith.constant 0 : index
    %9 = vector.load %arg3[%c0_6, %c0_7] : memref<256x128xbf16, #tpu.memory_space<vmem>>, vector<256x128xbf16>
    %cst_8 = arith.constant dense<0.000000e+00> : vector<8x128xf32>
    %10 = tpu.matmul %8, %9, %cst_8 {dimension_numbers = #tpu.dot_dimension_numbers<[1], [0], [0], [1], [0, 0, 1, 1], [], []>} : vector<8x256xbf16>, vector<256x128xbf16>, vector<8x128xf32> -> vector<8x128xf32>
    %c0_9 = arith.constant 0 : index
    %c0_10 = arith.constant 0 : index
    %11 = vector.load %arg4[%c0_9, %c0_10] : memref<1x128xf32, #tpu.memory_space<vmem>>, vector<1x128xf32>
    %12 = vector.broadcast %11 : vector<1x128xf32> to vector<8x128xf32>
    %13 = arith.addf %10, %12 : vector<8x128xf32>
    %c0_11 = arith.constant 0 : index
    %c0_12 = arith.constant 0 : index
    %14 = vector.load %arg5[%c0_11, %c0_12] : memref<8x128xf32, #tpu.memory_space<vmem>>, vector<8x128xf32>
    tpu.vector_store %arg5[%c0_11, %c0_12], %13 {strides = array<i32>} : memref<8x128xf32, #tpu.memory_space<vmem>>, vector<8x128xf32>,
    return
  }
}

</mosaic_0001>

<bundles_post_ra>
// kernel: forward.3
= control target key start
LH: loop header
LB: loop body
LE: loop exit
PB: predicated region body
PF: predicated region fallthrough
CT: control target
= control target key end

     0   :  { %v56_v51 = vlaneseq  ;;  %s789_s1 = inlined_call_operand.vmem [shape: bf16[256,256], index: 1, kind: input, shape index: {}]   ;;  %s790_s0 = inlined_call_operand.vmem [shape: bf16[8,256], index: 0, kind: input, shape index: {}]   ;;  %s791_s3 = inlined_call_operand.vmem [shape: bf16[256,128], index: 3, kind: input, shape index: {}]   ;;  %s792_s2 = inlined_call_operand.vmem [shape: f32[1,256], index: 2, kind: input, shape index: {}]   ;;  %s793_s4 = inlined_call_operand.vmem [shape: f32[1,128], index: 4, kind: input, shape index: {}]   ;;  %s794_s5 = inlined_call_operand.vmem [shape: f32[8,128], index: 5, kind: output, shape index: {}]  }
   0x1   :  { %v531_v0 = vld [vmem:[%s789_s1 + $0x74] ss:$8 sps:$4 sm:$0xff]   ;;  %v533_v1 = vld [vmem:[%s789_s1 + $0x70] ss:$8 sps:$4 sm:$0xff]   ;;  %v534_v2 = vld [vmem:[%s789_s1 + $0x64] ss:$8 sps:$4 sm:$0xff]  }
   0x2   :  { %233 = vmatprep.subr.bf16.mxu0 %v531_v0  ;;  %v536_v3 = vld [vmem:[%s789_s1 + $0x60] ss:$8 sps:$4 sm:$0xff]   ;;  %v537_v4 = vld [vmem:[%s789_s1 + $0x54] ss:$8 sps:$4 sm:$0xff]   ;;  %v539_v5 = vld [vmem:[%s789_s1 + $0x50] ss:$8 sps:$4 sm:$0xff]  }
   0x3   :  { %234 = vmatpush1.bf16.msra.mxu0 %v533_v1  ;;  %v540_v6 = vld [vmem:[%s789_s1 + $0x44] ss:$8 sps:$4 sm:$0xff]   ;;  %v542_v7 = vld [vmem:[%s789_s1 + $0x40] ss:$8 sps:$4 sm:$0xff]   ;;  %v543_v8 = vld [vmem:[%s789_s1 + $0x34] ss:$8 sps:$4 sm:$0xff]  }
   0x4   :  { %235 = vmatprep.subr.bf16.mxu0 %v534_v2  ;;  %v545_v9 = vld [vmem:[%s789_s1 + $0x30] ss:$8 sps:$4 sm:$0xff]   ;;  %v546_v10 = vld [vmem:[%s789_s1 + $0x24] ss:$8 sps:$4 sm:$0xff]   ;;  %v548_v11 = vld [vmem:[%s789_s1 + $0x20] ss:$8 sps:$4 sm:$0xff]  }
   0x5   :  { %v549_v12 = vld [vmem:[%s789_s1 + $0x14] ss:$8 sps:$4 sm:$0xff]   ;;  %v551_v13 = vld [vmem:[%s789_s1 + $0x10] ss:$8 sps:$4 sm:$0xff]   ;;  %v672_v14 = vld [vmem:[%s790_s0] sm:$0xff]  ;;  %v57_v52 = vshrl.u32 %v56_v51, 7 }
   0x6   :  { %v552_v15 = vld [vmem:[%s789_s1 + $0x4] ss:$8 sps:$4 sm:$0xff]   ;;  %v459_v16 = vcombine.high %v672_v14, %v672_v14  ;;  %v581_v17 = vld [vmem:[%s791_s3 + $0x78] sm:$0xff]   ;;  %v583_v19 = vld [vmem:[%s791_s3 + $0x70] sm:$0xff]   ;;  %v458_v46 = vcombine.low %v672_v14, %v672_v14 }
   0x7   :  { %236 = vmatpush1.bf16.msra.mxu0 %v536_v3  ;;  %v582_v18 = vld [vmem:[%s791_s3 + $0x38] sm:$0xff]   ;;  %v554_v20 = vld [vmem:[%s789_s1] ss:$8 sps:$4 sm:$0xff]   ;;  %509 = vmatprep.subr.bf16.mxu1 %v581_v17  ;;  %v584_v21 = vld [vmem:[%s791_s3 + $0x30] sm:$0xff]   ;;  %v58_v53 = vsub.s32 0, %v57_v52  ;;  %v62_v55 = vsub.s32 1, %v57_v52 }
   0x8   :  { %237 = vmatprep.subr.bf16.mxu0 %v537_v4  ;;  %265 = vmatprep.mubr.bf16.mxu0 %v459_v16  ;;  %v585_v22 = vld [vmem:[%s791_s3 + $0x68] sm:$0xff]   ;;  %v555_v23 = vld [vmem:[%s789_s1 + $0xf4] ss:$8 sps:$4 sm:$0xff]   ;;  %v557_v24 = vld [vmem:[%s789_s1 + $0xf0] ss:$8 sps:$4 sm:$0xff]  }
   0x9   :  { %510 = vmatpush3.bf16.msra.mxu1 %v582_v18  ;;  %v586_v25 = vld [vmem:[%s791_s3 + $0x28] sm:$0xff]   ;;  %v587_v26 = vld [vmem:[%s791_s3 + $0x60] sm:$0xff]   ;;  %v589_v30 = vld [vmem:[%s791_s3 + $0x58] sm:$0xff]  }
   0xa   :  { %511 = vmatprep.subr.bf16.mxu1 %v583_v19  ;;  %v558_v27 = vld [vmem:[%s789_s1 + $0xe4] ss:$8 sps:$4 sm:$0xff]   ;;  %v560_v28 = vld [vmem:[%s789_s1 + $0xe0] ss:$8 sps:$4 sm:$0xff]   ;;  %v561_v31 = vld [vmem:[%s789_s1 + $0xd4] ss:$8 sps:$4 sm:$0xff]  }
   0xb   :  { %238 = vmatpush1.bf16.msra.mxu0 %v539_v5  ;;  %v588_v29 = vld [vmem:[%s791_s3 + $0x20] sm:$0xff]   ;;  %v590_v32 = vld [vmem:[%s791_s3 + $0x18] sm:$0xff]   ;;  %v591_v34 = vld [vmem:[%s791_s3 + $0x50] sm:$0xff]  }
   0xc   :  { %239 = vmatprep.subr.bf16.mxu0 %v540_v6  ;;  %v563_v33 = vld [vmem:[%s789_s1 + $0xd0] ss:$8 sps:$4 sm:$0xff]   ;;  %v564_v35 = vld [vmem:[%s789_s1 + $0xc4] ss:$8 sps:$4 sm:$0xff]   ;;  %v566_v37 = vld [vmem:[%s789_s1 + $0xc0] ss:$8 sps:$4 sm:$0xff]  }
   0xd   :  { %512 = vmatpush3.bf16.msra.mxu1 %v584_v21  ;;  %v592_v36 = vld [vmem:[%s791_s3 + $0x10] sm:$0xff]   ;;  %v570_v40 = vld [vmem:[%s789_s1 + $0xa4] ss:$8 sps:$4 sm:$0xff]   ;;  %v572_v41 = vld [vmem:[%s789_s1 + $0xa0] ss:$8 sps:$4 sm:$0xff]  }
   0xe   :  { %513 = vmatprep.subr.bf16.mxu1 %v585_v22  ;;  %v567_v38 = vld [vmem:[%s789_s1 + $0xb4] ss:$8 sps:$4 sm:$0xff]   ;;  %v569_v39 = vld [vmem:[%s789_s1 + $0xb0] ss:$8 sps:$4 sm:$0xff]   ;;  %v576_v44 = vld [vmem:[%s789_s1 + $0x84] ss:$8 sps:$4 sm:$0xff]  }
   0xf   :  { %240 = vmatpush1.bf16.msra.mxu0 %v542_v7  ;;  %v573_v42 = vld [vmem:[%s789_s1 + $0x94] ss:$8 sps:$4 sm:$0xff]   ;;  %v575_v43 = vld [vmem:[%s789_s1 + $0x90] ss:$8 sps:$4 sm:$0xff]   ;;  %v578_v45 = vld [vmem:[%s789_s1 + $0x80] ss:$8 sps:$4 sm:$0xff]  }
  0x10   :  { %241 = vmatprep.subr.bf16.mxu0 %v543_v8  ;;  %v593_v47 = vld [vmem:[%s791_s3 + $0x48] sm:$0xff]   ;;  %v595_v49 = vld [vmem:[%s791_s3 + $0x40] sm:$0xff]  }
  0x11   :  { %514 = vmatpush3.bf16.msra.mxu1 %v586_v25  ;;  %v594_v48 = vld [vmem:[%s791_s3 + $0x8] sm:$0xff]   ;;  %v596_v50 = vld [vmem:[%s791_s3] sm:$0xff]  }
  0x12   :  { %515 = vmatprep.subr.bf16.mxu1 %v587_v26  ;;  %v54_v54 = vld [vmem:[%s792_s2] sm:$0x3] }
  0x13   :  { %242 = vmatpush1.bf16.msra.mxu0 %v545_v9  ;;  %v59_v56 = vrot.slane %v54_v54, %v58_v53  ;;  %v63_v57 = vrot.slane %v54_v54, %v62_v55  ;;  %v492_v5 = vld [vmem:[%s793_s4] ss:$0 sm:$0xff] }
  0x14   :  { %243 = vmatprep.subr.bf16.mxu0 %v546_v10 }
  0x15   :  { %516 = vmatpush3.bf16.msra.mxu1 %v588_v29 }
  0x16   :  { %517 = vmatprep.subr.bf16.mxu1 %v589_v30 }
  0x17   :  { %244 = vmatpush1.bf16.msra.mxu0 %v548_v11 }
  0x18   :  { %245 = vmatprep.subr.bf16.mxu0 %v549_v12 }
  0x19   :  { %518 = vmatpush3.bf16.msra.mxu1 %v590_v32 }
  0x1a   :  { %519 = vmatprep.subr.bf16.mxu1 %v591_v34 }
  0x1b   :  { %246 = vmatpush1.bf16.msra.mxu0 %v551_v13 }
  0x1c   :  { %247 = vmatprep.subr.bf16.mxu0 %v552_v15 }
  0x1d   :  { %520 = vmatpush3.bf16.msra.mxu1 %v592_v36 }
  0x1e   :  { %521 = vmatprep.subr.bf16.mxu1 %v593_v47 }
  0x1f   :  { %248 = vmatpush1.bf16.msra.mxu0 %v554_v20 }
  0x20   :  { %249 = vmatprep.subr.bf16.mxu0 %v555_v23 }
  0x21   :  { %522 = vmatpush3.bf16.msra.mxu1 %v594_v48 }
  0x22   :  { %523 = vmatprep.subr.bf16.mxu1 %v595_v49 }
  0x23   :  { %250 = vmatpush2.bf16.msra.mxu0 %v557_v24 }
  0x24   :  { %251 = vmatprep.subr.bf16.mxu0 %v558_v27 }
  0x25   :  { %524 = vmatpush3.bf16.msra.mxu1 %v596_v50 }
  0x27   :  { %252 = vmatpush2.bf16.msra.mxu0 %v560_v28 }
  0x28   :  { %253 = vmatprep.subr.bf16.mxu0 %v561_v31 }
  0x2b   :  { %254 = vmatpush2.bf16.msra.mxu0 %v563_v33 }
  0x2c   :  { %255 = vmatprep.subr.bf16.mxu0 %v564_v35 }
  0x2f   :  { %256 = vmatpush2.bf16.msra.mxu0 %v566_v37 }
  0x30   :  { %257 = vmatprep.subr.bf16.mxu0 %v567_v38 }
  0x33   :  { %258 = vmatpush2.bf16.msra.mxu0 %v569_v39 }
  0x34   :  { %259 = vmatprep.subr.bf16.mxu0 %v570_v40 }
  0x37   :  { %260 = vmatpush2.bf16.msra.mxu0 %v572_v41 }
  0x38   :  { %261 = vmatprep.subr.bf16.mxu0 %v573_v42 }
  0x3b   :  { %262 = vmatpush2.bf16.msra.mxu0 %v575_v43 }
  0x3c   :  { %263 = vmatprep.subr.bf16.mxu0 %v576_v44 }
  0x3f   :  { %264 = vmatpush2.bf16.msra.mxu0 %v578_v45 }
  0x42   :  { %266 = vmatmul.mubr.bf16.vlgmr.msra.gmra.mxu0 %v458_v46 }
 0x102   :  { %v267_v58 = vpop.f32.mrf.mxu0 }
 0x103   :  { %v268_v59 = vadd.f32 %v267_v58, %v59_v56 }
 0x104   :  { %v269_v60 = vpop.f32.mrf.mxu0 }
 0x105   :  { %v270_v61 = vadd.f32 %v269_v60, %v63_v57  ;;  %v274_v62 = vmax.f32 %v268_v59, 0.0 }
 0x106   :  { %v271_v63 = vpop.f32.mrf.mxu0 }
 0x107   :  { %v275_v0 = vmax.f32 %v270_v61, 0.0  ;;  %v276_v3 = vpack.c.bf16 %v274_v62, %v274_v62 }
 0x108   :  { %v272_v1 = vpop.f32.mrf.mxu0 }
 0x109   :  { %v277_v2 = vpack.c.bf16 %v275_v0, %v275_v0 }
 0x10b   :  { %445 = vmatprep.mubr.bf16.mxu1 %v277_v2 }
 0x10c   :  { %446 = vmatmul.mubr.bf16.vlgmr.msra.gmra.mxu1 %v276_v3 }
 0x1cc   :  { %v525_v4 = vpop.f32.mrf.mxu1 }
 0x1ce   :  { %v526_v6 = vpop.f32.mrf.mxu1 }
 0x1cf   :  { %v527_v7 = vadd.f32 %v526_v6, %v525_v4 }
 0x1d0   :  { %v528_v8 = vpop.f32.mrf.mxu1 }
 0x1d1   :  { %v448_v9 = vadd.f32 %v527_v7, %v492_v5 }
 0x1d2   :  { %v529_v10 = vpop.f32.mrf.mxu1 }
 0x1d3   :  { %453 = vst [vmem:[%s794_s5] sm:$0xff] %v448_v9 }

// kernel: forward.2
= control target key start
LH: loop header
LB: loop body
LE: loop exit
PB: predicated region body
PF: predicated region fallthrough
CT: control target
= control target key end

     0   :  { %11 = vsyncpa [#allocation3], 0  ;;  %s2235_s0 = inlined_call_operand.vmem [shape: bf16[2,2,16,128], index: 0, kind: input, shape index: {}]   ;;  %s2236_s1 = inlined_call_operand.hbm [shape: bf16[128,128], index: 1, kind: input, shape index: {}]   ;;  %s2237_s2 = inlined_call_operand.hbm [shape: bf16[128,128], index: 2, kind: input, shape index: {}]   ;;  %s2238_s3 = inlined_call_operand.hbm [shape: bf16[128,128], index: 3, kind: input, shape index: {}]   ;;  %s2239_s4 = inlined_call_operand.vmem [shape: bf16[2,128,128], index: 4, kind: input, shape index: {}]   ;;  %s2240_s5 = inlined_call_operand.vmem [shape: f32[1,128], index: 5, kind: input, shape index: {}]   ;;  %s2241_s6 = inlined_call_operand.vmem [shape: f32[2,16,128], index: 6, kind: output, shape index: {}]  }
   0x1   :  { %12 = vsyncpa [#allocation5], 0  ;;  %s1881_s21 = smov 0  }
   0x2 LB: > { %s1887_s22 = sadd.s32 4294967295, %s1837_s21   ;;  %p1300_p0 = scmp.ge.s32.totalorder %s1837_s21, 1  ;;  %s1837_s21 = sphi %s1881_s21, %s18_s21  }
   0x3   : > { %p180_p1 = scmp.lt.s32.totalorder %s1837_s21, 3  ;;  %p1666_p2 = scmp.eq.s32.totalorder %s1887_s22, 0 }
   0x4   : > { %s1839_s24 = smov [#allocation4]   ;;  %s1840_s26 = smov [#allocation2]  }
   0x5   : > { %p1892_p3 = pnand %p1300_p0, %p180_p1  ;;  %s205_s25 = sshll.u32 %s1839_s24, 4  ;;  %s206_s25 = int_to_ptr.vmem [resolvable:$true] %s205_s25 }
   0x6   : > { %s192_s27 = sshll.u32 %s1840_s26, 4  ;;  %s1841_s29 = smov [#allocation6]   ;;  %s193_s27 = int_to_ptr.vmem [resolvable:$true] %s192_s27 }
   0x7   : > { %p1656_p4 = pneg %p1892_p3  ;;  %s218_s30 = sshll.u32 %s1841_s29, 4  ;;  %s1904_s30 = int_to_ptr.vmem [resolvable:$true] %s218_s30 }
   0x8   : > { %s1756_s7 = scalar_lea.vmem %s206_s25, 1024  ;;  %p1764_p10 = scmp.lt.s32.totalorder %s206_s25, %s206_s25 }
   0x9   : > { %p1900_p5 = pnand %p1666_p2, %p1656_p4  ;;  %p1757_p7 = scmp.ne.s32.totalorder %s206_s25, %s1756_s7 }
   0xa   : > { %p1765_p11 = scmp.lt.s32.totalorder %s1756_s7, %s1756_s7 }
   0xb   : > { %p1747_p6 = pneg %p1900_p5 }
   0xc   : > { %p1766_p12 = por %p1765_p11, %p1764_p10 }
   0xd   : > { %p1759_p8 = pnand %p1757_p7, %p1747_p6 }
   0xf   : > { %p1760_p9 = pneg %p1759_p8 }
  0x11   : > { %p1767_p13 = pnand %p1766_p12, %p1760_p9 }
  0x13   : > { %1770 = shalt.err (!%p1767_p13)
}
  0x14   : > { %s1842_s8 = smov 64   ;;  %s1843_s9 = smov 4  }
  0x15   : > { %1662 = dma.hbm_to_vmem [thread:$0]  (!%p1900_p5), %s2237_s2, 1024, %s206_s25, [#allocation5], %s1842_s8, %s1842_s8, %s1843_s9  }
  0x16   : > { %s1782_s12 = scalar_lea.vmem %s193_s27, 1024  ;;  %p1790_p7 = scmp.lt.s32.totalorder %s193_s27, %s193_s27 }
  0x17   : > { %p1783_p0 = scmp.ne.s32.totalorder %s193_s27, %s1782_s12  ;;  %p1791_p8 = scmp.lt.s32.totalorder %s1782_s12, %s1782_s12 }
  0x19   : > { %p1785_p1 = pnand %p1783_p0, %p1747_p6  ;;  %p1792_p10 = por %p1791_p8, %p1790_p7 }
  0x1b   : > { %p1786_p4 = pneg %p1785_p1 }
  0x1d   : > { %p1793_p9 = pnand %p1792_p10, %p1786_p4 }
  0x1f   : > { %1796 = shalt.err (!%p1793_p9)
}
  0x20   : > { %1659 = dma.hbm_to_vmem [thread:$0]  (!%p1900_p5), %s2236_s1, 1024, %s193_s27, [#allocation3], %s1842_s8, %s1842_s8, %s1843_s9  }
  0x21   : > { %s1808_s15 = scalar_lea.vmem %s1904_s30, 1024  ;;  %p1816_p0 = scmp.lt.s32.totalorder %s1904_s30, %s1904_s30 }
  0x22   : > { %p1809_p11 = scmp.ne.s32.totalorder %s1904_s30, %s1808_s15  ;;  %p1817_p1 = scmp.lt.s32.totalorder %s1808_s15, %s1808_s15 }
  0x24   : > { %p1811_p12 = pnand %p1809_p11, %p1747_p6  ;;  %p1818_p4 = por %p1817_p1, %p1816_p0 }
  0x26   : > { %p1812_p13 = pneg %p1811_p12 }
  0x28   : > { %p1819_p7 = pnand %p1818_p4, %p1812_p13 }
  0x2a   : > { %1822 = shalt.err (!%p1819_p7)
}
  0x2b   : > { %1665 = dma.hbm_to_vmem [thread:$0]  (!%p1900_p5), %s2238_s3, 1024, %s1904_s30, [#allocation5], %s1842_s8, %s1842_s8, %s1843_s9  }
  0x2c   : > { %248 = sbr.rel (%p1892_p3) target bundleno = 2156 (0x86c), region = 44 }
  0x31   : > { %1828 = dma.done.wait (%p1666_p2), [#allocation3], 1024  }
  0x32   : > { %1830 = vsyncadd (%p1666_p2), [#allocation3], 4294966272 }
  0x33   : > { %1832 = dma.done.wait (%p1666_p2), [#allocation5], 2048  }
  0x34   : > { %1834 = vsyncadd (%p1666_p2), [#allocation5], 4294965248  ;;  %v1844_v0 = vmov 0.0   ;;  %vm1845_vm0 = vmmov 0   ;;  %v1953_v1 = vld [vmem:[#allocation4 + $0x38] sm:$0xff]   ;;  %v1958_v3 = vld [vmem:[#allocation4 + $0x30] sm:$0xff]   ;;  %v304_v36 = vlaneseq }
  0x35   : > { %1480 = vmatprep.subr.bf16.mxu1 %v1844_v0  ;;  %1460 = vmatprep.subr.bf16.mxu0 %v1844_v0  ;;  %v1955_v2 = vld [vmem:[#allocation2 + $0x38] sm:$0xff]   ;;  %v1962_v4 = vld [vmem:[#allocation2 + $0x30] sm:$0xff]   ;;  %p286_p2 = scmp.lt.s32.totalorder %s1887_s22, 1  ;;  %v1967_v5 = vld [vmem:[#allocation4 + $0x28] sm:$0xff]   ;;  %vm677_vm2 = vcmask 130048  }
  0x36   : > { %1496 = vmatprep.mubr.msk.bf16.mxu1 %vm1845_vm0, %v1844_v0  ;;  %1476 = vmatprep.mubr.msk.bf16.mxu0 %vm1845_vm0, %v1844_v0  ;;  %v1971_v6 = vld [vmem:[#allocation2 + $0x28] sm:$0xff]   ;;  %v1978_v7 = vld [vmem:[#allocation4 + $0x20] sm:$0xff]   ;;  %v1987_v9 = vld [vmem:[#allocation4 + $0x18] sm:$0xff]   ;;  %v2087_v37 = vand.u32 127, %v304_v36 }
  0x37   : > { %1481 = vmatpush3.bf16.msra.mxu1 %v1953_v1  ;;  %1461 = vmatpush3.bf16.msra.mxu0 %v1955_v2  ;;  %s2245_s22 = smov (!%p286_p2, %s1887_s22), 1  ;;  %v1982_v8 = vld [vmem:[#allocation2 + $0x20] sm:$0xff]   ;;  %v1991_v10 = vld [vmem:[#allocation2 + $0x18] sm:$0xff]   ;;  %v2001_v11 = vld [vmem:[#allocation4 + $0x10] sm:$0xff]  }
  0x38   : > { %1482 = vmatprep.subr.bf16.mxu1 %v1844_v0  ;;  %1462 = vmatprep.subr.bf16.mxu0 %v1844_v0  ;;  %s1378_s18 = sshll.u32 %s2245_s22, 4  ;;  %v2003_v12 = vld [vmem:[#allocation2 + $0x10] sm:$0xff]   ;;  %v2009_v13 = vld [vmem:[#allocation4 + $0x8] sm:$0xff]   ;;  %v2017_v15 = vld [vmem:[#allocation4] sm:$0xff]   ;;  %vm306_vm1 = vcmp.lt.s32.totalorder %v2087_v37, 10 }
  0x39   : > { %s1998_s23 = scalar_lea.vmem %s2235_s0, %s1378_s18  ;;  %v2011_v14 = vld [vmem:[#allocation2 + $0x8] sm:$0xff]   ;;  %v2019_v16 = vld [vmem:[#allocation2] sm:$0xff]   ;;  %v2037_v28 = vld [vmem:[#allocation6 + $0x38] sm:$0xff]   ;;  %s295_s15 = scalar_lea.vmem %s2241_s6, %s1378_s18 }
  0x3a   : > { %v1703_v17 = vld [vmem:[%s1998_s23] sm:$0xff]   ;;  %v2040_v29 = vld [vmem:[#allocation6 + $0x30] sm:$0xff]   ;;  %v2044_v30 = vld [vmem:[#allocation6 + $0x28] sm:$0xff]  }
  0x3b   : > { %1483 = vmatpush3.bf16.msra.mxu1 %v1958_v3  ;;  %1463 = vmatpush3.bf16.msra.mxu0 %v1962_v4  ;;  %v2048_v31 = vld [vmem:[#allocation6 + $0x20] sm:$0xff]   ;;  %v2052_v32 = vld [vmem:[#allocation6 + $0x18] sm:$0xff]   ;;  %v2056_v33 = vld [vmem:[#allocation6 + $0x10] sm:$0xff]  }
  0x3c   : > { %1484 = vmatprep.subr.bf16.mxu1 %v1844_v0  ;;  %1464 = vmatprep.subr.bf16.mxu0 %v1844_v0  ;;  %v2060_v34 = vld [vmem:[#allocation6 + $0x8] sm:$0xff]   ;;  %v2064_v35 = vld [vmem:[#allocation6] sm:$0xff]  }
  0x3f   : > { %1485 = vmatpush3.bf16.msra.mxu1 %v1967_v5  ;;  %1465 = vmatpush3.bf16.msra.mxu0 %v1971_v6 }
  0x40   : > { %1486 = vmatprep.subr.bf16.mxu1 %v1844_v0  ;;  %1466 = vmatprep.subr.bf16.mxu0 %v1844_v0 }
  0x43   : > { %1487 = vmatpush3.bf16.msra.mxu1 %v1978_v7  ;;  %1467 = vmatpush3.bf16.msra.mxu0 %v1982_v8 }
  0x44   : > { %1488 = vmatprep.subr.bf16.mxu1 %v1844_v0  ;;  %1468 = vmatprep.subr.bf16.mxu0 %v1844_v0 }
  0x47   : > { %1489 = vmatpush3.bf16.msra.mxu1 %v1987_v9  ;;  %1469 = vmatpush3.bf16.msra.mxu0 %v1991_v10 }
  0x48   : > { %1490 = vmatprep.subr.bf16.mxu1 %v1844_v0  ;;  %1470 = vmatprep.subr.bf16.mxu0 %v1844_v0 }
  0x4b   : > { %1491 = vmatpush3.bf16.msra.mxu1 %v2001_v11  ;;  %1471 = vmatpush3.bf16.msra.mxu0 %v2003_v12 }
  0x4c   : > { %1492 = vmatprep.subr.bf16.mxu1 %v1844_v0  ;;  %1472 = vmatprep.subr.bf16.mxu0 %v1844_v0 }
  0x4f   : > { %1493 = vmatpush3.bf16.msra.mxu1 %v2009_v13  ;;  %1473 = vmatpush3.bf16.msra.mxu0 %v2011_v14 }
  0x50   : > { %1494 = vmatprep.subr.bf16.mxu1 %v1844_v0  ;;  %1474 = vmatprep.subr.bf16.mxu0 %v1844_v0 }
  0x53   : > { %1495 = vmatpush3.bf16.msra.mxu1 %v2017_v15  ;;  %1475 = vmatpush3.bf16.msra.mxu0 %v2019_v16 }
  0x54   : > { %1520 = vmatprep.subr.bf16.mxu1 %v1844_v0  ;;  %1500 = vmatprep.subr.bf16.mxu0 %v1844_v0 }
  0x56   : > { %1497 = vmatmul.mubr.bf16.vlgmr.msra.gmra.mxu1 %v1703_v17  ;;  %1477 = vmatmul.mubr.bf16.vlgmr.msra.gmra.mxu0 %v1703_v17 }
  0x57   : > { %1522 = vmatprep.mubr.msk.bf16.mxu1 %vm1845_vm0, %v1844_v0  ;;  %1516 = vmatprep.mubr.msk.bf16.mxu0 %vm1845_vm0, %v1844_v0 }
  0x58   : > { %1501 = vmatpush3.bf16.msra.mxu0 %v2037_v28 }
  0x59   : > { %1502 = vmatprep.subr.bf16.mxu0 %v1844_v0 }
  0x5c   : > { %1503 = vmatpush3.bf16.msra.mxu0 %v2040_v29 }
  0x5d   : > { %1504 = vmatprep.subr.bf16.mxu0 %v1844_v0 }
  0x60   : > { %1505 = vmatpush3.bf16.msra.mxu0 %v2044_v30 }
  0x61   : > { %1506 = vmatprep.subr.bf16.mxu0 %v1844_v0 }
  0x64   : > { %1507 = vmatpush3.bf16.msra.mxu0 %v2048_v31 }
  0x65   : > { %1508 = vmatprep.subr.bf16.mxu0 %v1844_v0 }
  0x68   : > { %1509 = vmatpush3.bf16.msra.mxu0 %v2052_v32 }
  0x69   : > { %1510 = vmatprep.subr.bf16.mxu0 %v1844_v0 }
  0x6c   : > { %1511 = vmatpush3.bf16.msra.mxu0 %v2056_v33 }
  0x6d   : > { %1512 = vmatprep.subr.bf16.mxu0 %v1844_v0 }
  0x70   : > { %1513 = vmatpush3.bf16.msra.mxu0 %v2060_v34 }
  0x71   : > { %1514 = vmatprep.subr.bf16.mxu0 %v1844_v0 }
  0x74   : > { %1515 = vmatpush3.bf16.msra.mxu0 %v2064_v35 }
  0x75   : > { %1552 = vmatprep.subr.bf16.mxu0 %v1844_v0 }
  0x77   : > { %1517 = vmatmul.mubr.bf16.vlgmr.msra.gmra.mxu0 %v1703_v17  ;;  %v1714_v17 = vld [vmem:[%s2239_s4 + $0x28] sm:$0xff]  }
  0x78   : > { %1553 = vmatpush3.bf16.msra.mxu0 %v1955_v2  ;;  %1568 = vmatprep.mubr.msk.bf16.mxu0 %vm1845_vm0, %v1844_v0 }
  0x79   : > { %1554 = vmatprep.subr.bf16.mxu0 %v1844_v0 }
  0x7c   : > { %1555 = vmatpush3.bf16.msra.mxu0 %v1962_v4 }
  0x7d   : > { %1556 = vmatprep.subr.bf16.mxu0 %v1844_v0 }
  0x80   : > { %1557 = vmatpush3.bf16.msra.mxu0 %v1971_v6 }
  0x81   : > { %1558 = vmatprep.subr.bf16.mxu0 %v1844_v0 }
  0x84   : > { %1559 = vmatpush3.bf16.msra.mxu0 %v1982_v8 }
  0x85   : > { %1560 = vmatprep.subr.bf16.mxu0 %v1844_v0 }
  0x88   : > { %1561 = vmatpush3.bf16.msra.mxu0 %v1991_v10 }
  0x89   : > { %1562 = vmatprep.subr.bf16.mxu0 %v1844_v0 }
  0x8c   : > { %1563 = vmatpush3.bf16.msra.mxu0 %v2003_v12  ;;  %v1712_v12 = vld [vmem:[%s2239_s4 + $0x38] sm:$0xff]  }
  0x8d   : > { %1564 = vmatprep.subr.bf16.mxu0 %v1844_v0 }
  0x90   : > { %1565 = vmatpush3.bf16.msra.mxu0 %v2011_v14 }
  0x91   : > { %1566 = vmatprep.subr.bf16.mxu0 %v1844_v0 }
  0x94   : > { %1567 = vmatpush3.bf16.msra.mxu0 %v2019_v16  ;;  %v1713_v16 = vld [vmem:[%s2239_s4 + $0x30] sm:$0xff]  }
  0x95   : > { %1592 = vmatprep.subr.bf16.mxu0 %v1844_v0 }
 0x116   : > { %v518_v18 = vpop.f32.mrf.mxu1  ;;  %v413_v19 = vpop.f32.mrf.mxu0 }
 0x118   : > { %v1498_v20 = vpop.f32.mrf.mxu1  ;;  %v1478_v21 = vpop.f32.mrf.mxu0 }
 0x119   : > { %v1717_v20 = vld [vmem:[%s2239_s4 + $0x10] sm:$0xff]   ;;  %v1718_v21 = vld [vmem:[%s2239_s4 + $0x8] sm:$0xff]  }
 0x11a   : > { %v521_v22 = vpop.f32.mrf.mxu1  ;;  %v416_v24 = vpop.f32.mrf.mxu0 }
 0x11b   : > { %v631_v23 = vpack.c.bf16 %v521_v22, %v518_v18  ;;  %v630_v27 = vpack.c.bf16 %v416_v24, %v413_v19  ;;  %v1715_v18 = vld [vmem:[%s2239_s4 + $0x20] sm:$0xff]   ;;  %v1716_v19 = vld [vmem:[%s2239_s4 + $0x18] sm:$0xff]  }
 0x11c   : > { %v1499_v25 = vpop.f32.mrf.mxu1  ;;  %v1479_v26 = vpop.f32.mrf.mxu0  ;;  %v1719_v22 = vld [vmem:[%s2239_s4] sm:$0xff]  }
 0x11d   : > { %1521 = vmatpush3.bf16.xpose.msra.mxu1 %v631_v23  ;;  %v1720_v23 = vld [vmem:[%s1998_s23 + $0x8] sm:$0xff]  }
 0x11e   : > { %1526 = vmatprep.subr.bf16.mxu1 %v1844_v0  ;;  %1569 = vmatmul.mubr.bf16.vlgmr.msra.gmra.mxu0 %v1720_v23 }
 0x11f   : > { %1593 = vmatpush3.bf16.msra.mxu0 %v2037_v28  ;;  %1608 = vmatprep.mubr.msk.bf16.mxu0 %vm1845_vm0, %v1844_v0 }
 0x120   : > { %1594 = vmatprep.subr.bf16.mxu0 %v1844_v0 }
 0x123   : > { %1595 = vmatpush3.bf16.msra.mxu0 %v2040_v29 }
 0x124   : > { %1523 = vmatmul.mubr.bf16.vlgmr.msra.gmra.mxu1 %v630_v27  ;;  %1596 = vmatprep.subr.bf16.mxu0 %v1844_v0 }
 0x125   : > { %1528 = vmatprep.mubr.msk.bf16.mxu1 %vm1845_vm0, %v1844_v0 }
 0x127   : > { %1597 = vmatpush3.bf16.msra.mxu0 %v2044_v30 }
 0x128   : > { %1598 = vmatprep.subr.bf16.mxu0 %v1844_v0 }
 0x12b   : > { %1599 = vmatpush3.bf16.msra.mxu0 %v2048_v31 }
 0x12c   : > { %1600 = vmatprep.subr.bf16.mxu0 %v1844_v0 }
 0x12f   : > { %1601 = vmatpush3.bf16.msra.mxu0 %v2052_v32 }
 0x130   : > { %1602 = vmatprep.subr.bf16.mxu0 %v1844_v0 }
 0x133   : > { %1603 = vmatpush3.bf16.msra.mxu0 %v2056_v33 }
 0x134   : > { %1604 = vmatprep.subr.bf16.mxu0 %v1844_v0 }
 0x137   : > { %v623_v58 = vpop.f32.mrf.mxu0  ;;  %1605 = vmatpush3.bf16.msra.mxu0 %v2060_v34 }
 0x138   : > { %1606 = vmatprep.subr.bf16.mxu0 %v1844_v0 }
 0x139   : > { %v1518_v59 = vpop.f32.mrf.mxu0 }
 0x13b   : > { %v626_v60 = vpop.f32.mrf.mxu0  ;;  %1607 = vmatpush3.bf16.msra.mxu0 %v2064_v35 }
 0x13c   : > { %v701_v61 = vpack.c.bf16 %v626_v60, %v623_v58  ;;  %1624 = vmatprep.subr.bf16.mxu0 %v1844_v0  ;;  %v1721_v60 = vld [vmem:[%s2239_s4 + $0x78] sm:$0xff]  }
 0x13d   : > { %v1519_v62 = vpop.f32.mrf.mxu0 }
 0x13e   : > { %1527 = vmatpush3.bf16.msra.mxu1 %v701_v61  ;;  %1609 = vmatmul.mubr.bf16.vlgmr.msra.gmra.mxu0 %v1720_v23  ;;  %v1722_v61 = vld [vmem:[%s2239_s4 + $0x70] sm:$0xff]   ;;  %v1723_v62 = vld [vmem:[%s2239_s4 + $0x68] sm:$0xff]  }
 0x13f   : > { %1532 = vmatprep.subr.bf16.mxu1 %v1844_v0  ;;  %1640 = vmatprep.mubr.msk.bf16.mxu0 %vm1845_vm0, %v1844_v0 }
 0x140   : > { %1625 = vmatpush3.bf16.msra.mxu0 %v1721_v60 }
 0x141   : > { %1626 = vmatprep.subr.bf16.mxu0 %v1844_v0 }
 0x144   : > { %1627 = vmatpush3.bf16.msra.mxu0 %v1722_v61 }
 0x145   : > { %1628 = vmatprep.subr.bf16.mxu0 %v1844_v0 }
 0x148   : > { %1629 = vmatpush3.bf16.msra.mxu0 %v1723_v62 }
 0x149   : > { %1630 = vmatprep.subr.bf16.mxu0 %v1844_v0 }
 0x1e4   : > { %v666_v38 = vpop.f32.mrf.mxu1 }
 0x1e5   : > { %v673_v39 = vmul.f32 0.2236068, %v666_v38 }
 0x1e6   : > { %v1524_v40 = vpop.f32.mrf.mxu1 }
 0x1e7   : > { %v675_v41 = vsel %vm306_vm1, %v673_v39, -1e+30 }
 0x1e8   : > { %v669_v42 = vpop.f32.mrf.mxu1  ;;  %v678_v43 = vsel %vm677_vm2, %v675_v41, -inf }
 0x1e9   : > { %v674_v44 = vmul.f32 0.2236068, %v669_v42  ;;  %679 = vmax.xlane.f32.xlu0 %v678_v43 }
 0x1ea   : > { %v1525_v45 = vpop.f32.mrf.mxu1 }
 0x1eb   : > { %v676_v46 = vsel %vm306_vm1, %v674_v44, -1e+30 }
 0x1ec   : > { %v681_v47 = vsel %vm677_vm2, %v676_v46, -inf }
 0x1ed   : > { %682 = vmax.xlane.f32.xlu0 %v681_v47 }
 0x272   : > { %v680_v48 = vpop.xlane.xlu0 %679 }
 0x273   : > { %v684_v49 = vsub.f32 %v675_v41, %v680_v48 }
 0x275   : > { %v686_v50 = vmul.f32 1.442695, %v684_v49 }
 0x276   : > { %v683_v51 = vpop.xlane.xlu0 %682 }
 0x277   : > { %1729 = vpow2.f32 %v686_v50  ;;  %v685_v52 = vsub.f32 %v676_v46, %v683_v51 }
 0x279   : > { %v688_v53 = vmul.f32 1.442695, %v685_v52 }
 0x27b   : > { %1731 = vpow2.f32 %v688_v53 }
 0x284   : > { %v1730_v54 = vpop.eup %1729 }
 0x285   : > { %v690_v55 = vsel %vm677_vm2, %v1730_v54, 0.0 }
 0x286   : > { %691 = vadd.xlane.f32.xlu1 %v690_v55 }
 0x288   : > { %v1732_v56 = vpop.eup %1731 }
 0x289   : > { %v693_v57 = vsel %vm677_vm2, %v1732_v56, 0.0 }
 0x28a   : > { %694 = vadd.xlane.f32.xlu1 %v693_v57 }
 0x30f   : > { %v692_v63 = vpop.xlane.xlu1 %691 }
 0x310   : > { %1733 = vrcp.f32 %v692_v63  ;;  %v1724_v63 = vld [vmem:[%s2239_s4 + $0x60] sm:$0xff]  }
 0x311   : > { %1631 = vmatpush3.bf16.msra.mxu0 %v1724_v63 }
 0x312   : > { %1632 = vmatprep.subr.bf16.mxu0 %v1844_v0 }
 0x313   : > { %v695_v2 = vpop.xlane.xlu1 %694 }
 0x314   : > { %1735 = vrcp.f32 %v695_v2  ;;  %v1725_v2 = vld [vmem:[%s2239_s4 + $0x58] sm:$0xff]  }
 0x315   : > { %1633 = vmatpush3.bf16.msra.mxu0 %v1725_v2 }
 0x316   : > { %1634 = vmatprep.subr.bf16.mxu0 %v1844_v0 }
 0x31d   : > { %v1734_v4 = vpop.eup %1733 }
 0x31e   : > { %v697_v8 = vmul.f32 %v1734_v4, %v1730_v54  ;;  %v1726_v4 = vld [vmem:[%s2239_s4 + $0x50] sm:$0xff]  }
 0x31f   : > { %1635 = vmatpush3.bf16.msra.mxu0 %v1726_v4 }
 0x320   : > { %1636 = vmatprep.subr.bf16.mxu0 %v1844_v0 }
 0x321   : > { %v1736_v6 = vpop.eup %1735 }
 0x322   : > { %v699_v10 = vmul.f32 %v1736_v6, %v1732_v56 }
 0x324   : > { %v700_v14 = vpack.c.bf16 %v699_v10, %v697_v8 }
 0x326   : > { %1529 = vmatmul.mubr.msk.bf16.vlgmr.msra.gmra.mxu1 %vm677_vm2, %v700_v14 }
 0x327   : > { %1533 = vmatpush3.bf16.msra.mxu1 %v1712_v12  ;;  %1548 = vmatprep.mubr.msk.bf16.mxu1 %vm1845_vm0, %v1844_v0 }
 0x328   : > { %1534 = vmatprep.subr.bf16.mxu1 %v1844_v0 }
 0x32b   : > { %1535 = vmatpush3.bf16.msra.mxu1 %v1713_v16 }
 0x32c   : > { %1536 = vmatprep.subr.bf16.mxu1 %v1844_v0 }
 0x32f   : > { %1537 = vmatpush3.bf16.msra.mxu1 %v1714_v17 }
 0x330   : > { %1538 = vmatprep.subr.bf16.mxu1 %v1844_v0 }
 0x333   : > { %1539 = vmatpush3.bf16.msra.mxu1 %v1715_v18  ;;  %v1727_v18 = vld [vmem:[%s2239_s4 + $0x48] sm:$0xff]  }
 0x334   : > { %1540 = vmatprep.subr.bf16.mxu1 %v1844_v0  ;;  %1637 = vmatpush3.bf16.msra.mxu0 %v1727_v18 }
 0x335   : > { %1638 = vmatprep.subr.bf16.mxu0 %v1844_v0 }
 0x337   : > { %1541 = vmatpush3.bf16.msra.mxu1 %v1716_v19  ;;  %v1728_v19 = vld [vmem:[%s2239_s4 + $0x40] sm:$0xff]  }
 0x338   : > { %1542 = vmatprep.subr.bf16.mxu1 %v1844_v0  ;;  %1639 = vmatpush3.bf16.msra.mxu0 %v1728_v19 }
 0x33b   : > { %1543 = vmatpush3.bf16.msra.mxu1 %v1717_v20 }
 0x33c   : > { %1544 = vmatprep.subr.bf16.mxu1 %v1844_v0 }
 0x33f   : > { %1545 = vmatpush3.bf16.msra.mxu1 %v1718_v21 }
 0x340   : > { %1546 = vmatprep.subr.bf16.mxu1 %v1844_v0 }
 0x343   : > { %1547 = vmatpush3.bf16.msra.mxu1 %v1719_v22 }
 0x344   : > { %1572 = vmatprep.subr.bf16.mxu1 %v1844_v0 }
 0x3e6   : > { %v739_v24 = vpop.f32.mrf.mxu1 }
 0x3e8   : > { %v1530_v25 = vpop.f32.mrf.mxu1 }
 0x3e9   : > { %v1313_v25 = vld [vmem:[%s2240_s5] ss:$0 sm:$0xff] }
 0x3ea   : > { %v742_v26 = vpop.f32.mrf.mxu1 }
 0x3eb   : > { %v746_v27 = vpack.c.bf16 %v742_v26, %v739_v24 }
 0x3ec   : > { %v1531_v28 = vpop.f32.mrf.mxu1 }
 0x3ed   : > { %1549 = vmatmul.mubr.bf16.vlgmr.msra.gmra.mxu1 %v746_v27 }
 0x3ee   : > { %1573 = vmatpush3.bf16.msra.mxu1 %v1953_v1  ;;  %1588 = vmatprep.mubr.msk.bf16.mxu1 %vm1845_vm0, %v1844_v0  ;;  %v897_v1 = vpop.f32.mrf.mxu0 }
 0x3ef   : > { %1574 = vmatprep.subr.bf16.mxu1 %v1844_v0 }
 0x3f2   : > { %1575 = vmatpush3.bf16.msra.mxu1 %v1958_v3  ;;  %v1570_v3 = vpop.f32.mrf.mxu0 }
 0x3f3   : > { %1576 = vmatprep.subr.bf16.mxu1 %v1844_v0 }
 0x3f6   : > { %1577 = vmatpush3.bf16.msra.mxu1 %v1967_v5  ;;  %v900_v5 = vpop.f32.mrf.mxu0 }
 0x3f7   : > { %1578 = vmatprep.subr.bf16.mxu1 %v1844_v0 }
 0x3fa   : > { %1579 = vmatpush3.bf16.msra.mxu1 %v1978_v7  ;;  %v986_v7 = vpack.c.bf16 %v900_v5, %v897_v1 }
 0x3fb   : > { %1580 = vmatprep.subr.bf16.mxu1 %v1844_v0 }
 0x3fe   : > { %1581 = vmatpush3.bf16.msra.mxu1 %v1987_v9  ;;  %v1571_v9 = vpop.f32.mrf.mxu0 }
 0x3ff   : > { %1582 = vmatprep.subr.bf16.mxu1 %v1844_v0 }
 0x400   : > { %v979_v37 = vpop.f32.mrf.mxu0 }
 0x402   : > { %1583 = vmatpush3.bf16.msra.mxu1 %v2001_v11  ;;  %v1610_v56 = vpop.f32.mrf.mxu0 }
 0x403   : > { %1584 = vmatprep.subr.bf16.mxu1 %v1844_v0 }
 0x404   : > { %v982_v57 = vpop.f32.mrf.mxu0 }
 0x405   : > { %v1056_v59 = vpack.c.bf16 %v982_v57, %v979_v37 }
 0x406   : > { %1585 = vmatpush3.bf16.msra.mxu1 %v2009_v13  ;;  %v1611_v58 = vpop.f32.mrf.mxu0 }
 0x407   : > { %1586 = vmatprep.subr.bf16.mxu1 %v1844_v0 }
 0x40a   : > { %1587 = vmatpush3.bf16.msra.mxu1 %v2017_v15 }
 0x40b   : > { %1612 = vmatprep.subr.bf16.mxu1 %v1844_v0 }
 0x40d   : > { %1589 = vmatmul.mubr.bf16.vlgmr.msra.gmra.mxu1 %v1720_v23 }
 0x40e   : > { %1614 = vmatprep.mubr.msk.bf16.mxu1 %vm1845_vm0, %v1844_v0 }
 0x4ad   : > { %v2175_v11 = vpop.f32.mrf.mxu1 }
 0x4ae   : > { %v852_v26 = vadd.f32 %v1313_v25, %v2175_v11 }
 0x4af   : > { %v1550_v29 = vpop.f32.mrf.mxu1 }
 0x4b1   : > { %v2177_v30 = vpop.f32.mrf.mxu1 }
 0x4b2   : > { %v853_v1 = vadd.f32 %v1313_v25, %v2177_v30 }
 0x4b3   : > { %v1551_v13 = vpop.f32.mrf.mxu1 }
 0x4cd   : > { %v938_v31 = vpop.f32.mrf.mxu1 }
 0x4cf   : > { %v1590_v32 = vpop.f32.mrf.mxu1 }
 0x4d1   : > { %v941_v15 = vpop.f32.mrf.mxu1 }
 0x4d2   : > { %v987_v33 = vpack.c.bf16 %v941_v15, %v938_v31 }
 0x4d3   : > { %v1591_v34 = vpop.f32.mrf.mxu1 }
 0x4d4   : > { %1613 = vmatpush3.bf16.xpose.msra.mxu1 %v987_v33 }
 0x4d5   : > { %1618 = vmatprep.subr.bf16.mxu1 %v1844_v0 }
 0x4db   : > { %1615 = vmatmul.mubr.bf16.vlgmr.msra.gmra.mxu1 %v986_v7 }
 0x4dc   : > { %1620 = vmatprep.mubr.msk.bf16.mxu1 %vm1845_vm0, %v1844_v0  ;;  %1619 = vmatpush3.bf16.msra.mxu1 %v1056_v59 }
 0x59b   : > { %v1022_v35 = vpop.f32.mrf.mxu1 }
 0x59c   : > { %v1029_v36 = vmul.f32 0.2236068, %v1022_v35 }
 0x59d   : > { %v1616_v38 = vpop.f32.mrf.mxu1 }
 0x59e   : > { %v1031_v39 = vsel %vm306_vm1, %v1029_v36, -1e+30 }
 0x59f   : > { %v1025_v40 = vpop.f32.mrf.mxu1  ;;  %v1033_v41 = vsel %vm677_vm2, %v1031_v39, -inf }
 0x5a0   : > { %v1030_v42 = vmul.f32 0.2236068, %v1025_v40  ;;  %1034 = vmax.xlane.f32.xlu0 %v1033_v41 }
 0x5a1   : > { %v1617_v43 = vpop.f32.mrf.mxu1 }
 0x5a2   : > { %v1032_v44 = vsel %vm306_vm1, %v1030_v42, -1e+30 }
 0x5a3   : > { %v1036_v45 = vsel %vm677_vm2, %v1032_v44, -inf }
 0x5a4   : > { %1037 = vmax.xlane.f32.xlu1 %v1036_v45 }
 0x629   : > { %v1035_v46 = vpop.xlane.xlu0 %1034 }
 0x62a   : > { %v1039_v47 = vsub.f32 %v1031_v39, %v1035_v46 }
 0x62c   : > { %v1041_v48 = vmul.f32 1.442695, %v1039_v47 }
 0x62d   : > { %v1038_v49 = vpop.xlane.xlu1 %1037 }
 0x62e   : > { %1737 = vpow2.f32 %v1041_v48  ;;  %v1040_v50 = vsub.f32 %v1032_v44, %v1038_v49 }
 0x630   : > { %v1043_v51 = vmul.f32 1.442695, %v1040_v50 }
 0x632   : > { %1739 = vpow2.f32 %v1043_v51 }
 0x63b   : > { %v1738_v52 = vpop.eup %1737 }
 0x63c   : > { %v1045_v53 = vsel %vm677_vm2, %v1738_v52, 0.0 }
 0x63d   : > { %1046 = vadd.xlane.f32.xlu0 %v1045_v53 }
 0x63f   : > { %v1740_v54 = vpop.eup %1739 }
 0x640   : > { %v1048_v55 = vsel %vm677_vm2, %v1740_v54, 0.0 }
 0x641   : > { %1049 = vadd.xlane.f32.xlu1 %v1048_v55 }
 0x6c6   : > { %v1047_v6 = vpop.xlane.xlu0 %1046 }
 0x6c7   : > { %1741 = vrcp.f32 %v1047_v6 }
 0x6ca   : > { %v1050_v8 = vpop.xlane.xlu1 %1049 }
 0x6cb   : > { %1743 = vrcp.f32 %v1050_v8 }
 0x6d4   : > { %v1742_v10 = vpop.eup %1741 }
 0x6d5   : > { %v1052_v14 = vmul.f32 %v1742_v10, %v1738_v52 }
 0x6d8   : > { %v1744_v12 = vpop.eup %1743 }
 0x6d9   : > { %v1054_v16 = vmul.f32 %v1744_v12, %v1740_v54 }
 0x6db   : > { %v1055_v17 = vpack.c.bf16 %v1054_v16, %v1052_v14 }
 0x6dd   : > { %1621 = vmatmul.mubr.msk.bf16.vlgmr.msra.gmra.mxu1 %vm677_vm2, %v1055_v17 }
 0x79d   : > { %v1094_v20 = vpop.f32.mrf.mxu1 }
 0x79f   : > { %v1622_v21 = vpop.f32.mrf.mxu1 }
 0x7a1   : > { %v1097_v22 = vpop.f32.mrf.mxu1 }
 0x7a2   : > { %v1101_v23 = vpack.c.bf16 %v1097_v22, %v1094_v20 }
 0x7a3   : > { %v1623_v24 = vpop.f32.mrf.mxu1 }
 0x7a4   : > { %1641 = vmatmul.mubr.bf16.vlgmr.msra.gmra.mxu0 %v1101_v23 }
 0x864   : > { %v1201_v0 = vpop.f32.mrf.mxu0 }
 0x865   : > { %v1208_v27 = vadd.f32 %v1201_v0, %v852_v26 }
 0x866   : > { %v1642_v28 = vpop.f32.mrf.mxu0 }
 0x867   : > { %1210 = vst [vmem:[%s295_s15] sm:$0xff] %v1208_v27 }
 0x868   : > { %v1204_v3 = vpop.f32.mrf.mxu0 }
 0x869   : > { %v1209_v5 = vadd.f32 %v1204_v3, %v853_v1 }
 0x86a   : > { %v1643_v7 = vpop.f32.mrf.mxu0 }
 0x86b   : > { %1211 = vst [vmem:[%s295_s15 + $0x8] sm:$0xff] %v1209_v5 }
 0x86c PF: > { %s18_s21 = sadd.s32 1, %s1837_s21  }
 0x86d   : > { %p15_p3 = scmp.ge.s32.totalorder %s18_s21, 4  }
 0x86f   :  { %17 = sbr.rel (!%p15_p3) target bundleno = 2 (0x2), region = 89 }
 0x874   :  { %1233 = vsyncpa [#allocation3], 1 }
 0x875   :  { %1235 = vsyncpa [#allocation3 + $0x1], 1 }
 0x876   :  { %1236 = vsyncpa [#allocation5], 1 }

</bundles_post_ra>
